<compile_context>
chip_gen: v7x
topology: tpu7x:2x2x1
jax: 0.10.0
libtpu: 0.0.40
codegen_flags: <defaults>
</compile_context>

<pallas_src>
import functools

import jax
import jax.numpy as jnp
from jax.experimental import pallas as pl
from jax.experimental.pallas import tpu as pltpu


# ----------------------------- VMEM budgeting helpers -----------------------------

@functools.lru_cache(maxsize=None)
def _vmem_limit_bytes():
    """Generation-aware scoped-VMEM limit (~3/4 of physical VMEM; safe fallback 48 MiB)."""
    cap = 64 * 1024 * 1024  # conservative fallback == v7x physical VMEM
    try:
        c = getattr(pltpu.get_tpu_info(), "vmem_capacity_bytes", None)
        if c:
            cap = int(c)
    except Exception:
        pass
    return cap * 3 // 4


def _pick_tile(total, per_col_bytes):
    """Largest 128-multiple tile that divides `total` and fits a conservative VMEM budget."""
    budget = _vmem_limit_bytes() // 3  # headroom for weights, scratch and pipelining
    for t in (8192, 4096, 2048, 1024, 512, 256, 128):
        if total % t == 0 and t * per_col_bytes <= budget:
            return t
    return total  # full extent is always a legal block shape


# ------------- kernel 1: fused input_proj + k-projection + pooled partial sums -------------

def _proj_kernel(x_ref, w_in_ref, b_in_ref, w_k_ref, b_k_ref,
                 src_ref, kv_ref, psum_ref):
    # x: (Cb, tc) channel-major (HW tile on lanes)
    src = jnp.dot(w_in_ref[...], x_ref[...],
                  preferred_element_type=jnp.float32) + b_in_ref[...]
    src_ref[...] = src                                             # input_proj output
    kv_ref[...] = jnp.dot(w_k_ref[...], src,
                          preferred_element_type=jnp.float32) + b_k_ref[...]   # k-projection
    psum_ref[...] = jnp.sum(src, axis=-1, keepdims=True)           # partial sum for pooled mean


def fused_projections(x_cm, params):
    """x_cm (bs, Cb, HW) -> src_projT (bs, hidden, HW), kvT (bs, hidden, HW), psum (bs, nt, hidden, 1)."""
    bs, Cb, HW = x_cm.shape
    hidden = params["input_proj_w"].shape[0]
    tc = _pick_tile(HW, 8 * (Cb + 3 * hidden))
    nt = HW // tc
    return pl.pallas_call(
        _proj_kernel,
        out_shape=(jax.ShapeDtypeStruct((bs, hidden, HW), jnp.float32),
                   jax.ShapeDtypeStruct((bs, hidden, HW), jnp.float32),
                   jax.ShapeDtypeStruct((bs, nt, hidden, 1), jnp.float32)),
        grid=(bs, nt),
        in_specs=[
            pl.BlockSpec((None, Cb, tc), lambda b, t: (b, 0, t)),
            pl.BlockSpec((hidden, Cb), lambda b, t: (0, 0)),
            pl.BlockSpec((hidden, 1), lambda b, t: (0, 0)),
            pl.BlockSpec((hidden, hidden), lambda b, t: (0, 0)),
            pl.BlockSpec((hidden, 1), lambda b, t: (0, 0)),
        ],
        out_specs=(pl.BlockSpec((None, hidden, tc), lambda b, t: (b, 0, t)),
                   pl.BlockSpec((None, hidden, tc), lambda b, t: (b, 0, t)),
                   pl.BlockSpec((None, None, hidden, 1), lambda b, t: (b, t, 0, 0))),
        compiler_params=pltpu.CompilerParams(
            dimension_semantics=("parallel", "parallel"),
            vmem_limit_bytes=_vmem_limit_bytes()),
    )(x_cm, params["input_proj_w"], params["input_proj_b"],
      params["k_w"], params["k_b"])


# --------- kernel 2: fused mask-head + BN/ReLU + mu/diag/factor heads, global/rater split ---------

def _fused_head_kernel(src_ref, attn_ref, wsrc_ref, watt_ref, mb_ref,
                       bns_ref, bnb_ref,
                       wmu_ref, bmu_ref, wdg_ref, bdg_ref, wfc_ref, bfc_ref,
                       mug_ref, dgg_ref, fcg_ref, mur_ref, dgr_ref, fcr_ref,
                       part_ref):
    q = pl.program_id(2)

    # src-projection contribution is shared by all queries of this (batch, hw-tile):
    # compute once at q == 0 and keep it resident in VMEM scratch.
    @pl.when(q == 0)
    def _():
        part_ref[...] = jnp.dot(wsrc_ref[...], src_ref[...],
                                preferred_element_type=jnp.float32) + mb_ref[...]

    # mask-head stand-in 1x1 conv (channel-major), eval-mode BatchNorm (folded) + ReLU
    feat = part_ref[...] + jnp.dot(watt_ref[...], attn_ref[...],
                                   preferred_element_type=jnp.float32)
    feat = jnp.maximum(feat * bns_ref[...] + bnb_ref[...], 0.0)

    # three small head matmuls (mu / diagonal / factors, factors rank-major rows)
    mu = jnp.dot(wmu_ref[...], feat, preferred_element_type=jnp.float32) + bmu_ref[...]
    dg = jnp.abs(jnp.dot(wdg_ref[...], feat,
                         preferred_element_type=jnp.float32) + bdg_ref[...]) + 1e-5
    fc = jnp.dot(wfc_ref[...], feat, preferred_element_type=jnp.float32) + bfc_ref[...]

    @pl.when(q == 0)      # global (query-0) distribution parameters
    def _():
        mug_ref[...] = mu
        dgg_ref[...] = dg
        fcg_ref[...] = fc

    @pl.when(q > 0)       # per-rater distribution parameters
    def _():
        mur_ref[...] = mu
        dgr_ref[...] = dg
        fcr_ref[...] = fc


def fused_mask_and_heads(src_projT, bbox_mask, params):
    """-> mu_g (bs,nc,HW), diag_g, fac_g (bs,rank*nc,HW), mu_r (bs,rn,nc,HW), diag_r, fac_r."""
    bs, hidden, HW = src_projT.shape
    Q, nheads = bbox_mask.shape[1], bbox_mask.shape[2]
    assert Q >= 2, "need at least one rater (num_queries >= 2)"
    rn = Q - 1
    Cmid = params["w_src"].shape[0]
    nc = params["w_mu"].shape[0]
    rk_nc = params["w_fac"].shape[0]
    tc = _pick_tile(HW, 8 * (hidden + nheads + 2 * (2 * nc + rk_nc)) + 8 * Cmid)
    nt = HW // tc

    def rater_idx(b, t, q):
        # q==0 writes nothing to the rater outputs; it revisits block 0, which q==1
        # fully overwrites before any HBM writeback happens.
        return (b, jnp.maximum(q - 1, 0), 0, t)

    return pl.pallas_call(
        _fused_head_kernel,
        out_shape=(jax.ShapeDtypeStruct((bs, nc, HW), jnp.float32),
                   jax.ShapeDtypeStruct((bs, nc, HW), jnp.float32),
                   jax.ShapeDtypeStruct((bs, rk_nc, HW), jnp.float32),
                   jax.ShapeDtypeStruct((bs, rn, nc, HW), jnp.float32),
                   jax.ShapeDtypeStruct((bs, rn, nc, HW), jnp.float32),
                   jax.ShapeDtypeStruct((bs, rn, rk_nc, HW), jnp.float32)),
        grid=(bs, nt, Q),
        in_specs=[
            pl.BlockSpec((None, hidden, tc), lambda b, t, q: (b, 0, t)),
            pl.BlockSpec((None, None, nheads, tc), lambda b, t, q: (b, q, 0, t)),
            pl.BlockSpec((Cmid, hidden), lambda b, t, q: (0, 0)),
            pl.BlockSpec((Cmid, nheads), lambda b, t, q: (0, 0)),
            pl.BlockSpec((Cmid, 1), lambda b, t, q: (0, 0)),
            pl.BlockSpec((Cmid, 1), lambda b, t, q: (0, 0)),
            pl.BlockSpec((Cmid, 1), lambda b, t, q: (0, 0)),
            pl.BlockSpec((nc, Cmid), lambda b, t, q: (0, 0)),
            pl.BlockSpec((nc, 1), lambda b, t, q: (0, 0)),
            pl.BlockSpec((nc, Cmid), lambda b, t, q: (0, 0)),
            pl.BlockSpec((nc, 1), lambda b, t, q: (0, 0)),
            pl.BlockSpec((rk_nc, Cmid), lambda b, t, q: (0, 0)),
            pl.BlockSpec((rk_nc, 1), lambda b, t, q: (0, 0)),
        ],
        out_specs=(pl.BlockSpec((None, nc, tc), lambda b, t, q: (b, 0, t)),
                   pl.BlockSpec((None, nc, tc), lambda b, t, q: (b, 0, t)),
                   pl.BlockSpec((None, rk_nc, tc), lambda b, t, q: (b, 0, t)),
                   pl.BlockSpec((None, None, nc, tc), rater_idx),
                   pl.BlockSpec((None, None, nc, tc), rater_idx),
                   pl.BlockSpec((None, None, rk_nc, tc), rater_idx)),
        scratch_shapes=[pltpu.VMEM((Cmid, tc), jnp.float32)],
        compiler_params=pltpu.CompilerParams(
            dimension_semantics=("parallel", "parallel", "arbitrary"),
            vmem_limit_bytes=_vmem_limit_bytes()),
    )(src_projT, bbox_mask,
      params["w_src"], params["w_att"], params["mask_b"],
      params["bn_scale"], params["bn_bias"],
      params["w_mu"], params["b_mu"], params["w_diag"], params["b_diag"],
      params["w_fac"], params["b_fac"])


# ------------------- kernel 3: low-rank Gaussian variance + reparameterized samples -------------------

def _lowrank_kernel(mug_ref, dgg_ref, fcg_ref, mur_ref, dgr_ref, fcr_ref,
                    ewr_ref, edr_ref, ewg_ref, edg_ref,
                    varg_ref, varr_ref, sr_ref, sg_ref):
    dg = dgg_ref[...]          # (1, td)   global cov_diag
    dr = dgr_ref[...]          # (rn, td)  rater cov_diag
    fg = fcg_ref[...]          # (rank, td)      global cov_factor (rank-major)
    fr = fcr_ref[...]          # (rn, rank, td)  rater cov_factor
    ewr = ewr_ref[...]         # (rn, rank, 1)
    ewg = ewg_ref[...]         # (rn, rank, 1)

    # variance = cov_diag + sum_r cov_factor[:, r]^2
    varg_ref[...] = dg + jnp.sum(fg * fg, axis=0, keepdims=True)
    varr_ref[...] = dr + jnp.sum(fr * fr, axis=1)

    # rsample: mu + F @ eps_W + sqrt(diag) * eps_D
    contrib_r = jnp.sum(fr * ewr, axis=1)                     # (rn, td)
    contrib_g = jnp.sum(fg[None, :, :] * ewg, axis=1)         # (rn, td), global dist sampled rn times
    sr_ref[...] = mur_ref[...] + contrib_r + jnp.sqrt(dr) * edr_ref[...]
    sg_ref[...] = mug_ref[...] + contrib_g + jnp.sqrt(dg) * edg_ref[...]


def lowrank_var_and_sample(mu_g, diag_g, fac_g, mu_r, diag_r, fac_r,
                           eps_w_r, eps_d_r, eps_w_g, eps_d_g):
    bs, rn, D = mu_r.shape
    rank = fac_g.shape[1]
    per_col = 8 * (3 + rank + rn * (7 + rank))
    td = _pick_tile(D, per_col)
    nd = D // td
    return pl.pallas_call(
        _lowrank_kernel,
        out_shape=(jax.ShapeDtypeStruct((bs, 1, D), jnp.float32),
                   jax.ShapeDtypeStruct((bs, rn, D), jnp.float32),
                   jax.ShapeDtypeStruct((bs, rn, D), jnp.float32),
                   jax.ShapeDtypeStruct((bs, rn, D), jnp.float32)),
        grid=(bs, nd),
        in_specs=[
            pl.BlockSpec((None, 1, td), lambda b, d: (b, 0, d)),
            pl.BlockSpec((None, 1, td), lambda b, d: (b, 0, d)),
            pl.BlockSpec((None, rank, td), lambda b, d: (b, 0, d)),
            pl.BlockSpec((None, rn, td), lambda b, d: (b, 0, d)),
            pl.BlockSpec((None, rn, td), lambda b, d: (b, 0, d)),
            pl.BlockSpec((None, rn, rank, td), lambda b, d: (b, 0, 0, d)),
            pl.BlockSpec((None, rn, rank, 1), lambda b, d: (b, 0, 0, 0)),
            pl.BlockSpec((None, rn, td), lambda b, d: (b, 0, d)),
            pl.BlockSpec((None, rn, rank, 1), lambda b, d: (b, 0, 0, 0)),
            pl.BlockSpec((None, rn, td), lambda b, d: (b, 0, d)),
        ],
        out_specs=(pl.BlockSpec((None, 1, td), lambda b, d: (b, 0, d)),
                   pl.BlockSpec((None, rn, td), lambda b, d: (b, 0, d)),
                   pl.BlockSpec((None, rn, td), lambda b, d: (b, 0, d)),
                   pl.BlockSpec((None, rn, td), lambda b, d: (b, 0, d))),
        compiler_params=pltpu.CompilerParams(
            dimension_semantics=("parallel", "parallel"),
            vmem_limit_bytes=_vmem_limit_bytes()),
    )(mu_g, diag_g, fac_g, mu_r, diag_r, fac_r,
      eps_w_r, eps_d_r, eps_w_g, eps_d_g)


# ----------------------------- parameters -----------------------------

def init_params(key, cfg):
    hidden, Q, nheads = cfg["hidden"], cfg["num_queries"], cfg["nheads"]
    nc, rank, Cb = cfg["num_classes"], cfg["rank"], cfg["num_channels"]
    Cmid = 32
    ks = jax.random.split(key, 9)

    def w(k, shape, scale=0.05):
        return scale * jax.random.normal(k, shape, jnp.float32)

    # BatchNorm2d(32) defaults (gamma=1, beta=0, running stats 0/1), folded; channel-major (32,1).
    eps = 1e-5
    gamma = jnp.ones((Cmid, 1), jnp.float32)
    beta = jnp.zeros((Cmid, 1), jnp.float32)
    rmean = jnp.zeros((Cmid, 1), jnp.float32)
    rvar = jnp.ones((Cmid, 1), jnp.float32)
    bn_scale = gamma / jnp.sqrt(rvar + eps)
    bn_bias = beta - rmean * bn_scale

    return dict(
        query_embed=w(ks[0], (Q, hidden), 1.0),
        input_proj_w=w(ks[1], (hidden, Cb)),                 # (Cout, Cin) channel-major
        input_proj_b=jnp.zeros((hidden, 1), jnp.float32),
        q_w=w(ks[2], (hidden, hidden)),
        q_b=jnp.zeros((hidden,), jnp.float32),
        k_w=w(ks[3], (hidden, hidden)),                      # (Cout, Cin) channel-major
        k_b=jnp.zeros((hidden, 1), jnp.float32),
        w_src=w(ks[4], (Cmid, hidden)),                      # mask-head: src_proj part
        w_att=w(ks[5], (Cmid, nheads)),                      # mask-head: attention-map part
        mask_b=jnp.zeros((Cmid, 1), jnp.float32),
        bn_scale=bn_scale, bn_bias=bn_bias,
        w_mu=w(ks[6], (nc, Cmid)), b_mu=jnp.zeros((nc, 1), jnp.float32),
        w_diag=w(ks[7], (nc, Cmid)), b_diag=jnp.zeros((nc, 1), jnp.float32),
        # factor head rows in rank-major order: row r*nc + c  -> cov_factor[:, r] per-class map
        w_fac=w(ks[8], (rank * nc, Cmid)), b_fac=jnp.zeros((rank * nc, 1), jnp.float32),
    )


# ----------------------------- forward pass -----------------------------

def tab_forward(x, params, key, cfg, training=True):
    # x: backbone feature map (bs, num_channels, H, W) in NCHW.
    # TODO(synk): the actual backbone (ResNet + positional encoding) is an external module
    # not defined in the reference file; x stands in for features[-1].tensors.
    bs, Cb, H, W = x.shape
    HW = H * W
    hidden, Q, nheads = cfg["hidden"], cfg["num_queries"], cfg["nheads"]
    nc, rank = cfg["num_classes"], cfg["rank"]
    rn = Q - 1
    D = nc * HW

    # NCHW flatten == channel-major layout (HW on TPU lanes); no transpose needed.
    src_cm = x.reshape(bs, Cb, HW)

    # Fused input_proj + k-projection + pooled partial sums.                         [Pallas]
    src_projT, kvT, psum = fused_projections(src_cm, params)       # (bs,hidden,HW) x2
    pooled = jnp.sum(psum[:, :, :, 0], axis=1) / HW                # (bs, hidden), no HBM re-read

    # TODO(synk): the transformer encoder/decoder is an external module not defined in the
    # reference file; stand-in keeps shapes (memory = src_projT, hs from queries).
    hs = params["query_embed"][None, :, :] + pooled[:, None, :]    # (bs, Q, hidden)

    # bbox_attention (DETR MHAttentionMap): per-head spatial attention maps.
    d_head = hidden // nheads
    qv = hs @ params["q_w"] + params["q_b"]                        # (bs, Q, hidden)
    qh = qv.reshape(bs, Q, nheads, d_head)
    khT = kvT.reshape(bs, nheads, d_head, HW)
    logits = jnp.einsum("bqnd,bnds->bqns", qh, khT) * (float(d_head) ** -0.5)
    bbox_mask = jax.nn.softmax(logits, axis=-1)                    # (bs, Q, nheads, HW)

    # TODO(synk): MaskHeadSmallConv_UNet (3x3 convs, GroupNorm, FPN upsampling with backbone
    # skips) is not defined in the reference file; stand-in is a fused 1x1 conv over
    # [src_proj, bbox_mask] + BN + ReLU + mu/diagonal/factor heads in one tiled Pallas kernel.
    mu_g, dg_g, fc_g, mu_r, dg_r, fc_r = fused_mask_and_heads(src_projT, bbox_mask, params)

    # Only free (contiguous) reshapes between kernels 2 and 3 — no slicing / transposes.
    # TODO(synk): PyTorch raw-reinterprets the (nc*rank, H, W) factor conv output via
    # .view(bs, Q, nc*H*W, rank) (scattering neighbouring pixels across the rank axis);
    # here factor rows are rank-major so cov_factor[:, r] is the r-th per-class spatial map.
    # TODO(synk): PyTorch promotes mus/diagonals/factors to float64; TPU Pallas has no f64.
    mu_g_f = mu_g.reshape(bs, 1, D)
    dg_g_f = dg_g.reshape(bs, 1, D)
    fc_g_f = fc_g.reshape(bs, rank, D)
    mu_r_f = mu_r.reshape(bs, rn, D)
    dg_r_f = dg_r.reshape(bs, rn, D)
    fc_r_f = fc_r.reshape(bs, rn, rank, D)

    key_rw, key_rd, key_gw, key_gd = jax.random.split(key, 4)
    eps_w_r = jax.random.normal(key_rw, (bs, rn, rank, 1), jnp.float32)
    eps_d_r = jax.random.normal(key_rd, (bs, rn, D), jnp.float32)
    eps_w_g = jax.random.normal(key_gw, (bs, rn, rank, 1), jnp.float32)
    eps_d_g = jax.random.normal(key_gd, (bs, rn, D), jnp.float32)

    # Variances for all dists + rater samples + global samples (rsample == sample in value). [Pallas]
    var_g, var_r, samp_r, samp_g = lowrank_var_and_sample(
        mu_g_f, dg_g_f, fc_g_f, mu_r_f, dg_r_f, fc_r_f,
        eps_w_r, eps_d_r, eps_w_g, eps_d_g)

    event = (nc, H, W)   # ReshapedDistribution event_shape
    global_mu = mu_g.reshape((bs,) + event)
    rater_mus = mu_r.reshape((bs, rn) + event)
    global_var = var_g.reshape((bs,) + event)
    rater_vars = var_r.reshape((bs, rn) + event)
    rater_samples = samp_r.reshape((bs, rn) + event)
    global_samples = samp_g.reshape((bs, rn) + event)
    return global_mu, rater_mus, global_var, rater_vars, rater_samples, global_samples


# ----------------------------- driver -----------------------------

if __name__ == "__main__":
    cfg = dict(hidden=32, num_queries=4, nheads=4, num_classes=1, rank=5,
               num_channels=8)
    bs, H, W = 2, 16, 16

    key = jax.random.PRNGKey(0)
    k_x, k_p, k_s = jax.random.split(key, 3)
    params = init_params(k_p, cfg)
    x = jax.random.normal(k_x, (bs, cfg["num_channels"], H, W), jnp.float32)

    outs = tab_forward(x, params, k_s, cfg, training=True)
    outs = jax.block_until_ready(outs)

    g_mu, r_mus, g_var, r_vars, r_samp, g_samp = outs
    rn = cfg["num_queries"] - 1
    nc = cfg["num_classes"]
    assert g_mu.shape == (bs, nc, H, W)
    assert r_mus.shape == (bs, rn, nc, H, W)
    assert g_var.shape == (bs, nc, H, W)
    assert r_vars.shape == (bs, rn, nc, H, W)
    assert r_samp.shape == (bs, rn, nc, H, W)
    assert g_samp.shape == (bs, rn, nc, H, W)
    assert bool(jnp.all(g_var > 0)) and bool(jnp.all(r_vars > 0))
    assert all(bool(jnp.all(jnp.isfinite(o))) for o in outs)

    print("KERNEL_OK")
</pallas_src>

<mosaic_0001>
module attributes {stable_mosaic.version = 11 : i64} {
  func.func @_proj_kernel(%arg0: i32, %arg1: i32, %arg2: memref<1x8x256xf32, #tpu.memory_space<vmem>>, %arg3: memref<32x8xf32, #tpu.memory_space<vmem>>, %arg4: memref<32x1xf32, #tpu.memory_space<vmem>>, %arg5: memref<32x32xf32, #tpu.memory_space<vmem>>, %arg6: memref<32x1xf32, #tpu.memory_space<vmem>>, %arg7: memref<1x32x256xf32, #tpu.memory_space<vmem>>, %arg8: memref<1x32x256xf32, #tpu.memory_space<vmem>>, %arg9: memref<1x1x32x1xf32, #tpu.memory_space<vmem>>) attributes {dimension_semantics = [#tpu.dimension_semantics<parallel>, #tpu.dimension_semantics<parallel>], iteration_bounds = array<i64: 2, 1>, scalar_prefetch = 0 : i64, scratch_operands = 0 : i64, tpu.core_type = #tpu.core_type<tc>, window_params = [{transform_indices = @transform_0, window_bounds = array<i64: 1, 8, 256>}, {pipeline_mode = #tpu.pipeline_mode<synchronous>, transform_indices = @transform_1, window_bounds = array<i64: 32, 8>}, {pipeline_mode = #tpu.pipeline_mode<synchronous>, transform_indices = @transform_2, window_bounds = array<i64: 32, 1>}, {pipeline_mode = #tpu.pipeline_mode<synchronous>, transform_indices = @transform_3, window_bounds = array<i64: 32, 32>}, {pipeline_mode = #tpu.pipeline_mode<synchronous>, transform_indices = @transform_4, window_bounds = array<i64: 32, 1>}, {transform_indices = @transform_5, window_bounds = array<i64: 1, 32, 256>}, {transform_indices = @transform_6, window_bounds = array<i64: 1, 32, 256>}, {transform_indices = @transform_7, window_bounds = array<i64: 1, 1, 32, 1>}]} {
    %c0 = arith.constant 0 : index
    %c0_0 = arith.constant 0 : index
    %0 = vector.load %arg3[%c0, %c0_0] : memref<32x8xf32, #tpu.memory_space<vmem>>, vector<32x8xf32>
    %c0_1 = arith.constant 0 : index
    %c0_2 = arith.constant 0 : index
    %c0_3 = arith.constant 0 : index
    %1 = vector.load %arg2[%c0_1, %c0_2, %c0_3] : memref<1x8x256xf32, #tpu.memory_space<vmem>>, vector<1x8x256xf32>
    %2 = vector.shape_cast %1 : vector<1x8x256xf32> to vector<8x256xf32>
    %cst = arith.constant dense<0.000000e+00> : vector<32x256xf32>
    %3 = tpu.matmul %0, %2, %cst {dimension_numbers = #tpu.dot_dimension_numbers<[1], [0], [0], [1], [0, 0, 1, 1], [], []>} : vector<32x8xf32>, vector<8x256xf32>, vector<32x256xf32> -> vector<32x256xf32>
    %c0_4 = arith.constant 0 : index
    %c0_5 = arith.constant 0 : index
    %4 = vector.load %arg4[%c0_4, %c0_5] : memref<32x1xf32, #tpu.memory_space<vmem>>, vector<32x1xf32>
    %5 = vector.broadcast %4 : vector<32x1xf32> to vector<32x256xf32>
    %6 = arith.addf %3, %5 : vector<32x256xf32>
    %c0_6 = arith.constant 0 : index
    %c0_7 = arith.constant 0 : index
    %c0_8 = arith.constant 0 : index
    %7 = vector.load %arg7[%c0_6, %c0_7, %c0_8] : memref<1x32x256xf32, #tpu.memory_space<vmem>>, vector<1x32x256xf32>
    %8 = vector.shape_cast %7 : vector<1x32x256xf32> to vector<32x256xf32>
    %9 = vector.shape_cast %6 : vector<32x256xf32> to vector<1x32x256xf32>
    tpu.vector_store %arg7[%c0_6, %c0_7, %c0_8], %9 {strides = array<i32>} : memref<1x32x256xf32, #tpu.memory_space<vmem>>, vector<1x32x256xf32>,
    %c0_9 = arith.constant 0 : index
    %c0_10 = arith.constant 0 : index
    %10 = vector.load %arg5[%c0_9, %c0_10] : memref<32x32xf32, #tpu.memory_space<vmem>>, vector<32x32xf32>
    %cst_11 = arith.constant dense<0.000000e+00> : vector<32x256xf32>
    %11 = tpu.matmul %10, %6, %cst_11 {dimension_numbers = #tpu.dot_dimension_numbers<[1], [0], [0], [1], [0, 0, 1, 1], [], []>} : vector<32x32xf32>, vector<32x256xf32>, vector<32x256xf32> -> vector<32x256xf32>
    %c0_12 = arith.constant 0 : index
    %c0_13 = arith.constant 0 : index
    %12 = vector.load %arg6[%c0_12, %c0_13] : memref<32x1xf32, #tpu.memory_space<vmem>>, vector<32x1xf32>
    %13 = vector.broadcast %12 : vector<32x1xf32> to vector<32x256xf32>
    %14 = arith.addf %11, %13 : vector<32x256xf32>
    %c0_14 = arith.constant 0 : index
    %c0_15 = arith.constant 0 : index
    %c0_16 = arith.constant 0 : index
    %15 = vector.load %arg8[%c0_14, %c0_15, %c0_16] : memref<1x32x256xf32, #tpu.memory_space<vmem>>, vector<1x32x256xf32>
    %16 = vector.shape_cast %15 : vector<1x32x256xf32> to vector<32x256xf32>
    %17 = vector.shape_cast %14 : vector<32x256xf32> to vector<1x32x256xf32>
    tpu.vector_store %arg8[%c0_14, %c0_15, %c0_16], %17 {strides = array<i32>} : memref<1x32x256xf32, #tpu.memory_space<vmem>>, vector<1x32x256xf32>,
    %cst_17 = arith.constant dense<0.000000e+00> : vector<32xf32>
    %18 = vector.multi_reduction <add>, %6, %cst_17 [1] : vector<32x256xf32> to vector<32xf32>
    %19 = vector.shape_cast %18 : vector<32xf32> to vector<32x1xf32>
    %c0_18 = arith.constant 0 : index
    %c0_19 = arith.constant 0 : index
    %c0_20 = arith.constant 0 : index
    %c0_21 = arith.constant 0 : index
    %20 = vector.load %arg9[%c0_18, %c0_19, %c0_20, %c0_21] : memref<1x1x32x1xf32, #tpu.memory_space<vmem>>, vector<1x1x32x1xf32>
    %21 = vector.shape_cast %20 : vector<1x1x32x1xf32> to vector<32x1xf32>
    %22 = vector.shape_cast %19 : vector<32x1xf32> to vector<1x1x32x1xf32>
    tpu.vector_store %arg9[%c0_18, %c0_19, %c0_20, %c0_21], %22 {strides = array<i32>} : memref<1x1x32x1xf32, #tpu.memory_space<vmem>>, vector<1x1x32x1xf32>,
    return
  }
  func.func @transform_0(%arg0: i32, %arg1: i32) -> (i32, i32, i32) {
    %c0_i32 = arith.constant 0 : i32
    %c0_i32_0 = arith.constant 0 : i32
    return %arg0, %c0_i32, %arg1 : i32, i32, i32
  }
  func.func @transform_1(%arg0: i32, %arg1: i32) -> (i32, i32) {
    %c0_i32 = arith.constant 0 : i32
    %c0_i32_0 = arith.constant 0 : i32
    %c0_i32_1 = arith.constant 0 : i32
    return %c0_i32, %c0_i32_0 : i32, i32
  }
  func.func @transform_2(%arg0: i32, %arg1: i32) -> (i32, i32) {
    %c0_i32 = arith.constant 0 : i32
    %c0_i32_0 = arith.constant 0 : i32
    %c0_i32_1 = arith.constant 0 : i32
    return %c0_i32, %c0_i32_0 : i32, i32
  }
  func.func @transform_3(%arg0: i32, %arg1: i32) -> (i32, i32) {
    %c0_i32 = arith.constant 0 : i32
    %c0_i32_0 = arith.constant 0 : i32
    %c0_i32_1 = arith.constant 0 : i32
    return %c0_i32, %c0_i32_0 : i32, i32
  }
  func.func @transform_4(%arg0: i32, %arg1: i32) -> (i32, i32) {
    %c0_i32 = arith.constant 0 : i32
    %c0_i32_0 = arith.constant 0 : i32
    %c0_i32_1 = arith.constant 0 : i32
    return %c0_i32, %c0_i32_0 : i32, i32
  }
  func.func @transform_5(%arg0: i32, %arg1: i32) -> (i32, i32, i32) {
    %c0_i32 = arith.constant 0 : i32
    %c0_i32_0 = arith.constant 0 : i32
    return %arg0, %c0_i32, %arg1 : i32, i32, i32
  }
  func.func @transform_6(%arg0: i32, %arg1: i32) -> (i32, i32, i32) {
    %c0_i32 = arith.constant 0 : i32
    %c0_i32_0 = arith.constant 0 : i32
    return %arg0, %c0_i32, %arg1 : i32, i32, i32
  }
  func.func @transform_7(%arg0: i32, %arg1: i32) -> (i32, i32, i32, i32) {
    %c0_i32 = arith.constant 0 : i32
    %c0_i32_0 = arith.constant 0 : i32
    %c0_i32_1 = arith.constant 0 : i32
    return %arg0, %arg1, %c0_i32, %c0_i32_0 : i32, i32, i32, i32
  }
}

</mosaic_0001>

<bundles_post_ra>
// kernel: tpu_custom_call.1
= control target key start
LH: loop header
LB: loop body
LE: loop exit
PB: predicated region body
PF: predicated region fallthrough
CT: control target
= control target key end

     0   :  { %13 = vsyncpa [#allocation3], 0  ;;  %s1349_s0 = inlined_call_operand.vmem [shape: f32[2,8,256], index: 0, kind: input, shape index: {}]   ;;  %s1350_s1 = inlined_call_operand.vmem [shape: f32[32,8], index: 1, kind: input, shape index: {}]   ;;  %s1351_s2 = inlined_call_operand.vmem [shape: f32[32,1], index: 2, kind: input, shape index: {}]   ;;  %s1352_s3 = inlined_call_operand.vmem [shape: f32[32,32], index: 3, kind: input, shape index: {}]   ;;  %s1353_s4 = inlined_call_operand.vmem [shape: f32[32,1], index: 4, kind: input, shape index: {}]   ;;  %s1354_s5 = inlined_call_operand.hbm [shape: f32[2,32,256], index: 5, kind: output, shape index: {0}]   ;;  %s1355_s6 = inlined_call_operand.hbm [shape: f32[2,32,256], index: 6, kind: output, shape index: {1}]   ;;  %s1356_s7 = inlined_call_operand.vmem [shape: f32[2,1,32,1], index: 7, kind: output, shape index: {2}]  }
   0x1   :  { %15 = vsyncpa [#allocation3 + $0x1], 0 }
   0x2   :  { %16 = vsyncpa [#allocation5], 0 }
   0x3   :  { %18 = vsyncpa [#allocation5 + $0x1], 0  ;;  %s1108_s24 = smov 0   ;;  %s1110_s25 = smov 0  }
   0x4   :  { %s1112_s26 = smov 0   ;;  %s1114_s27 = smov 0  }
   0x5   :  { %s1116_s28 = smov 0   ;;  %s1118_s29 = smov 0  }
   0x6 LB: > { %s845_s30 = sadd.s32 4294967295, %s1060_s29   ;;  %s846_s8 = sadd.s32 4294967294, %s1060_s29   ;;  %s1060_s29 = sphi %s1118_s29, %s24_s29   ;;  %s1056_s28 = sphi %s1116_s28, %s1367_s28   ;;  %s1052_s27 = sphi %s1114_s27, %s1366_s27   ;;  %s1048_s26 = sphi %s1112_s26, %s1365_s26   ;;  %s1044_s25 = sphi %s1110_s25, %s1364_s25   ;;  %s1040_s24 = sphi %s1108_s24, %s1363_s24  }
   0x7   : > { %s36_s9 = sadd.s32 1, %s1056_s28  ;;  %s157_s10 = sadd.s32 1, %s1048_s26 }
   0x8   : > { %p38_p0 = scmp.ge.s32.totalorder %s36_s9, 2  ;;  %p167_p1 = scmp.ne.s32.totalorder %s1048_s26, %s1044_s25 }
   0x9   : > { %p168_p2 = scmp.eq.s32.totalorder %s845_s30, 1  ;;  %p173_p3 = scmp.ne.s32.totalorder %s1044_s25, %s1040_s24 }
   0xa   : > { %s1369_s9 = smov (%p38_p0, %s36_s9), 0  ;;  %p174_p5 = scmp.eq.s32.totalorder %s846_s8, 1 }
   0xb   : > { %p1148_p4 = por %p168_p2, %p167_p1  ;;  %s152_s12 = ssub.s32 %s1056_s28, %s1369_s9 }
   0xc   : > { %p849_p6 = scmp.ge.s32.totalorder %s1060_s29, 1  ;;  %p155_p7 = scmp.eq.s32.totalorder %s152_s12, 0 }
   0xd   : > { %p1155_p8 = por %p174_p5, %p173_p3  ;;  %p273_p9 = scmp.lt.s32.totalorder %s1060_s29, 3 }
   0xe   : > { %s1161_s14 = scalar_select %p155_p7, %s1048_s26, %s157_s10  }
   0xf   : > { %p274_p10 = pnand %p849_p6, %p273_p9 }
  0x10   : > { %p324_p11 = scmp.lt.s32.totalorder (!%p274_p10), %s1052_s27, 1  ;;  %v1062_v0 = vmov (!%p274_p10), 0.0   ;;  %v350_v1 = vld [vmem:[%s1351_s2] sm:$0xff] (!%p274_p10)  ;;  %v352_v2 = vld [vmem:[%s1351_s2 + $0x10] sm:$0xff] (!%p274_p10)  ;;  %v1063_v3 = vmov (!%p274_p10), 0   ;;  %v351_v4 = vld [vmem:[%s1351_s2 + $0x8] sm:$0xff] (!%p274_p10) }
  0x11   : > { %277 = sbr.rel (%p274_p10) target bundleno = 505 (0x1f9), region = 40  ;;  %451 = vmatprep.mubr.f32.mxu0 (!%p274_p10), %v1062_v0  ;;  %589 = vmatprep.mubr.f32.mxu1 (!%p274_p10), %v1062_v0  ;;  %v353_v5 = vld [vmem:[%s1351_s2 + $0x18] sm:$0xff] (!%p274_p10)  ;;  %v344_v8 = vld [vmem:[%s1350_s1] sm:$0xff] (!%p274_p10)  ;;  %vm374_vm0 = vcmask (!%p274_p10), 64512   ;;  %v345_v10 = vld [vmem:[%s1350_s1 + $0x8] sm:$0xff] (!%p274_p10)  ;;  %s1208_s10 = sand.u32 (!%p274_p10), 1, %s1044_s25  }
  0x12   : > { %948 = vset.pattern.permute.xlu0 (!%p274_p10), %v1063_v3  ;;  %949 = vset.pattern.permute.xlu1 (!%p274_p10), %v1063_v3  ;;  %v488_v9 = vld [vmem:[%s1353_s4] sm:$0xff] (!%p274_p10)  ;;  %v346_v11 = vld [vmem:[%s1350_s1 + $0x10] sm:$0xff] (!%p274_p10)  ;;  %v347_v12 = vld [vmem:[%s1350_s1 + $0x18] sm:$0xff] (!%p274_p10)  ;;  %s1358_s12 = sshll.u32 (!%p274_p10), %s1208_s10, 6  ;;  %vm512_vm1 = vcmask (!%p274_p10), 261120   ;;  %s1357_s22 = sshll.u32 (!%p274_p10), %s1052_s27, 10 }
  0x13   : > { %356 = vperm.xlu0 (!%p274_p10), %948, %v350_v1   ;;  %366 = vperm.xlu1 (!%p274_p10), %949, %v352_v2   ;;  %s1213_s15 = scalar_lea.vmem (!%p274_p10), [#allocation2], %s1358_s12  ;;  %v484_v41 = vld [vmem:[%s1352_s3] sm:$0xff] (!%p274_p10)  ;;  %v485_v42 = vld [vmem:[%s1352_s3 + $0x8] sm:$0xff] (!%p274_p10)  ;;  %v490_v43 = vld [vmem:[%s1353_s4 + $0x10] sm:$0xff] (!%p274_p10)  ;;  %s1254_s16 = scalar_lea.hbm (!%p274_p10), %s1354_s5, %s1357_s22 }
  0x14   : > { %v486_v44 = vld [vmem:[%s1352_s3 + $0x10] sm:$0xff] (!%p274_p10)  ;;  %v491_v45 = vld [vmem:[%s1353_s4 + $0x18] sm:$0xff] (!%p274_p10)  ;;  %v489_v47 = vld [vmem:[%s1353_s4 + $0x8] sm:$0xff] (!%p274_p10)  ;;  %s669_s23 = sshll.u32 (!%p274_p10), %s1213_s15, 4  ;;  %s640_s17 = scalar_lea.sflag (!%p274_p10), [#allocation3], %s1208_s10  ;;  %s1256_s23 = int_to_ptr.vmem [resolvable:$true] %s669_s23 }
  0x15   : > { %v487_v46 = vld [vmem:[%s1352_s3 + $0x18] sm:$0xff] (!%p274_p10)  ;;  %s950_s18 = scalar_lea.vmem (!%p274_p10), %s1256_s23, 1024 }
  0x16   : > { %p951_p12 = scmp.ne.s32.totalorder (!%p274_p10), %s1256_s23, %s950_s18 }
  0x17   : > { %361 = vperm.xlu0 (!%p274_p10), %948, %v351_v4   ;;  %371 = vperm.xlu1 (!%p274_p10), %949, %v353_v5  }
  0x18   : > { %s1173_s19 = scalar_select %p324_p11, %s1052_s27, 1 }
  0x19   : > { %p952_p13 = pnand %p951_p12, %p1148_p4 }
  0x1a   : > { %s872_s20 = sshll.u32 %s1173_s19, 4 }
  0x1b   : > { %s331_s8 = scalar_lea.vmem %s1349_s0, %s872_s20  ;;  %494 = vperm.xlu1 %949, %v488_v9   ;;  %p953_p0 = pneg %p952_p13 }
  0x1c   : > { %v349_v6 = vld [vmem:[%s331_s8 + $0x8] sm:$0xff]  ;;  %v348_v7 = vld [vmem:[%s331_s8] sm:$0xff]  ;;  %s1064_s20 = smov [#allocation2]  }
  0x1d   : > { %387 = vmatprep.subr.mxu0 %v349_v6  ;;  %s954_s21 = sshll.u32 %s1064_s20, 4  ;;  %s955_s21 = int_to_ptr.vmem [resolvable:$false] %s954_s21 }
  0x1e   : > { %388 = vmatpush1.msra.mxu0 %v348_v7  ;;  %p957_p1 = scmp.lt.s32.totalorder %s1256_s23, %s955_s21 }
  0x1f   : > { %856 = vmatmul.mubr.msk.f32.vlgmr.msra.gmra.mrb[0].mxu0 %vm374_vm0, %v344_v8 }
  0x20   : > { %457 = vmatprep.mubr.f32.mxu0 %v1062_v0 }
  0x23   : > { %857 = vmatmul.mubr.msk.f32.gmra.mrb[2].mxu0 %vm374_vm0, %v345_v10 }
  0x24   : > { %463 = vmatprep.mubr.f32.mxu0 %v1062_v0 }
  0x27   : > { %858 = vmatmul.mubr.msk.f32.gmra.mrb[4].mxu0 %vm374_vm0, %v346_v11 }
  0x28   : > { %469 = vmatprep.mubr.f32.mxu0 %v1062_v0 }
  0x2b   : > { %859 = vmatmul.mubr.msk.f32.gmra.mrb[6].mxu0 %vm374_vm0, %v347_v12 }
  0x92   : > { %v357_v13 = vpop.permute.xlu0 %356  ;;  %v367_v23 = vpop.permute.xlu1 %366 }
  0x96   : > { %v362_v18 = vpop.permute.xlu0 %361  ;;  %v372_v32 = vpop.permute.xlu1 %371 }
  0xf2   : > { %v453_v14 = vpop.f32.mrb[0].mxu0 }
  0xf3   : > { %v454_v15 = vadd.f32 %v453_v14, %v357_v13  ;;  %v455_v16 = vpop.f32.mrb[1].mxu0 }
  0xf4   : > { %v456_v17 = vadd.f32 %v455_v16, %v357_v13 }
  0xf5   : > { %476 = vst [vmem:[%s1213_s15] sm:$0xff] %v454_v15 }
  0xf6   : > { %477 = vst [vmem:[%s1213_s15 + $0x8] sm:$0xff] %v456_v17  ;;  %v459_v19 = vpop.f32.mrb[2].mxu0  ;;  %v622_v20 = vadd.f32 %v456_v17, %v454_v15 }
  0xf7   : > { %v460_v21 = vadd.f32 %v459_v19, %v362_v18  ;;  %v461_v22 = vpop.f32.mrb[3].mxu0 }
  0xf8   : > { %v462_v24 = vadd.f32 %v461_v22, %v362_v18  ;;  %623 = vadd.xlane.f32.xlu0 %v622_v20 }
  0xf9   : > { %478 = vst [vmem:[%s1213_s15 + $0x10] sm:$0xff] %v460_v21  ;;  %v878_v25 = vpack.c.bf16 %v460_v21, %v454_v15 }
  0xfa   : > { %479 = vst [vmem:[%s1213_s15 + $0x18] sm:$0xff] %v462_v24  ;;  %v465_v26 = vpop.f32.mrb[4].mxu0  ;;  %v625_v27 = vadd.f32 %v462_v24, %v460_v21  ;;  %v876_v28 = vpack.c.bf16 %v462_v24, %v456_v17 }
  0xfb   : > { %v466_v29 = vadd.f32 %v465_v26, %v367_v23  ;;  %v467_v30 = vpop.f32.mrb[5].mxu0 }
  0xfc   : > { %v468_v31 = vadd.f32 %v467_v30, %v367_v23  ;;  %626 = vadd.xlane.f32.xlu1 %v625_v27  ;;  %877 = vmatprep.subr.bf16.mxu1 %v876_v28 }
  0xfd   : > { %480 = vst [vmem:[%s1213_s15 + $0x20] sm:$0xff] %v466_v29  ;;  %879 = vmatpush1.bf16.msra.mxu1 %v878_v25 }
  0xfe   : > { %481 = vst [vmem:[%s1213_s15 + $0x28] sm:$0xff] %v468_v31  ;;  %v471_v33 = vpop.f32.mrb[6].mxu0  ;;  %v628_v34 = vadd.f32 %v468_v31, %v466_v29 }
  0xff   : > { %v472_v35 = vadd.f32 %v471_v33, %v372_v32  ;;  %v473_v36 = vpop.f32.mrb[7].mxu0 }
 0x100   : > { %v474_v37 = vadd.f32 %v473_v36, %v372_v32  ;;  %629 = vadd.xlane.f32.xlu0 %v628_v34 }
 0x101   : > { %482 = vst [vmem:[%s1213_s15 + $0x30] sm:$0xff] %v472_v35  ;;  %v882_v38 = vpack.c.bf16 %v472_v35, %v466_v29 }
 0x102   : > { %483 = vst [vmem:[%s1213_s15 + $0x38] sm:$0xff] %v474_v37  ;;  %v631_v39 = vadd.f32 %v474_v37, %v472_v35  ;;  %v880_v40 = vpack.c.bf16 %v474_v37, %v468_v31  ;;  %s956_s15 = scalar_lea.vmem %s955_s21, 2048 }
 0x103   : > { %p958_p2 = scmp.lt.s32.totalorder %s956_s15, %s950_s18 }
 0x104   : > { %632 = vadd.xlane.f32.xlu0 %v631_v39  ;;  %881 = vmatprep.subr.bf16.mxu1 %v880_v40 }
 0x105   : > { %883 = vmatpush1.bf16.msra.mxu1 %v882_v38  ;;  %p959_p3 = por %p958_p2, %p957_p1 }
 0x107   : > { %p960_p5 = pnand %p959_p3, %p953_p0 }
 0x108   : > { %860 = vmatmul.mubr.msk.f32.vlgmr.msra.gmra.mrb[0].mxu1 %vm512_vm1, %v484_v41 }
 0x109   : > { %595 = vmatprep.mubr.f32.mxu1 %v1062_v0 }
 0x10c   : > { %861 = vmatmul.mubr.msk.f32.gmra.mrb[2].mxu1 %vm512_vm1, %v485_v42 }
 0x10d   : > { %504 = vperm.xlu1 %949, %v490_v43   ;;  %601 = vmatprep.mubr.f32.mxu1 %v1062_v0 }
 0x110   : > { %862 = vmatmul.mubr.msk.f32.gmra.mrb[4].mxu1 %vm512_vm1, %v486_v44 }
 0x111   : > { %509 = vperm.xlu1 %949, %v491_v45   ;;  %607 = vmatprep.mubr.f32.mxu1 %v1062_v0 }
 0x114   : > { %863 = vmatmul.mubr.msk.f32.gmra.mrb[6].mxu1 %vm512_vm1, %v487_v46 }
 0x11a   : > { %499 = vperm.xlu0 %948, %v489_v47  }
 0x11b   : > { %963 = shalt.err (!%p960_p5)
}
 0x11c   : > { %s964_s30 = scalar_lea.hbm %s1254_s16, 1024  ;;  %s968_s20 = scalar_lea.hbm %s1354_s5, 2048 }
 0x11d   : > { %p965_p6 = scmp.ne.s32.totalorder %s1254_s16, %s964_s30  ;;  %p969_p10 = scmp.lt.u32.totalorder %s1254_s16, %s1354_s5 }
 0x11e   : > { %p970_p11 = scmp.lt.u32.totalorder %s968_s20, %s964_s30  ;;  %p972_p13 = scmp.lt.u32.totalorder %s964_s30, %s1254_s16 }
 0x11f   : > { %p966_p7 = pnand %p965_p6, %p1148_p4 }
 0x120   : > { %p971_p12 = por %p970_p11, %p969_p10 }
 0x121   : > { %p967_p9 = pneg %p966_p7 }
 0x122   : > { %p973_p0 = por %p972_p13, %p971_p12 }
 0x124   : > { %p974_p1 = pnand %p973_p0, %p967_p9 }
 0x126   : > { %977 = shalt.err (!%p974_p1)
}
 0x127   : > { %s1065_s18 = smov 256   ;;  %s1066_s15 = smov 16   ;;  %vm634_vm2 = vcmask 7168   ;;  %v495_v48 = vpop.permute.xlu1 %494 }
 0x128   : > { %884 = dma.vmem_to_hbm [thread:$0]  (%p1148_p4), %s1256_s23, 1024, %s1254_s16, %s640_s17, %s1065_s18, %s1065_s18, %s1066_s15  }
 0x129   : > { %s873_s12 = sshll.u32 %s1173_s19, 5  ;;  %s1361_s19 = sshll.u32 %s1208_s10, 6 }
 0x12a   : > { %s343_s30 = scalar_lea.vmem %s1356_s7, %s873_s12  ;;  %s311_s23 = scalar_lea.vmem [#allocation4], %s1361_s19 }
 0x12b   : > { %s687_s16 = sshll.u32 %s311_s23, 4  ;;  %s1362_s17 = sshll.u32 %s1052_s27, 10  ;;  %s1298_s16 = int_to_ptr.vmem [resolvable:$true] %s687_s16 }
 0x12c   : > { %s1296_s12 = scalar_lea.hbm %s1355_s6, %s1362_s17  ;;  %s645_s22 = scalar_lea.sflag [#allocation5], %s1208_s10 }
 0x12d   : > { %s978_s8 = scalar_lea.vmem %s1298_s16, 1024 }
 0x12e   : > { %p979_p2 = scmp.ne.s32.totalorder %s1298_s16, %s978_s8 }
 0x130   : > { %p980_p3 = pnand %p979_p2, %p1148_p4 }
 0x132   : > { %p981_p5 = pneg %p980_p3 }
 0x185   : > { %v624_v49 = vpop.xlane.xlu0 %623 }
 0x186   : > { %635 = vst.msk [vmem:[%s343_s30] sm:$0xff] %vm634_vm2, %v624_v49 }
 0x189   : > { %v627_v50 = vpop.xlane.xlu1 %626 }
 0x18a   : > { %636 = vst.msk [vmem:[%s343_s30 + $0x8] sm:$0xff] %vm634_vm2, %v627_v50 }
 0x18d   : > { %v630_v51 = vpop.xlane.xlu0 %629  ;;  %v505_v61 = vpop.permute.xlu1 %504 }
 0x18e   : > { %637 = vst.msk [vmem:[%s343_s30 + $0x10] sm:$0xff] %vm634_vm2, %v630_v51 }
 0x191   : > { %v633_v52 = vpop.xlane.xlu0 %632  ;;  %v510_v3 = vpop.permute.xlu1 %509 }
 0x192   : > { %638 = vst.msk [vmem:[%s343_s30 + $0x18] sm:$0xff] %vm634_vm2, %v633_v52  ;;  %s1067_s30 = smov [#allocation4]  }
 0x193   : > { %s982_s27 = sshll.u32 %s1067_s30, 4  ;;  %s983_s27 = int_to_ptr.vmem [resolvable:$false] %s982_s27 }
 0x194   : > { %s984_s19 = scalar_lea.vmem %s983_s27, 2048  ;;  %p985_p6 = scmp.lt.s32.totalorder %s1298_s16, %s983_s27 }
 0x195   : > { %p986_p7 = scmp.lt.s32.totalorder %s984_s19, %s978_s8 }
 0x197   : > { %p987_p9 = por %p986_p7, %p985_p6 }
 0x199   : > { %v500_v57 = vpop.permute.xlu0 %499  ;;  %p988_p10 = pnand %p987_p9, %p981_p5 }
 0x1db   : > { %v591_v53 = vpop.f32.mrb[0].mxu1 }
 0x1dc   : > { %v592_v54 = vadd.f32 %v591_v53, %v495_v48  ;;  %v593_v55 = vpop.f32.mrb[1].mxu1 }
 0x1dd   : > { %v594_v56 = vadd.f32 %v593_v55, %v495_v48 }
 0x1de   : > { %614 = vst [vmem:[%s311_s23] sm:$0xff] %v592_v54 }
 0x1df   : > { %615 = vst [vmem:[%s311_s23 + $0x8] sm:$0xff] %v594_v56  ;;  %v597_v58 = vpop.f32.mrb[2].mxu1 }
 0x1e0   : > { %v598_v59 = vadd.f32 %v597_v58, %v500_v57  ;;  %v599_v60 = vpop.f32.mrb[3].mxu1 }
 0x1e1   : > { %v600_v62 = vadd.f32 %v599_v60, %v500_v57 }
 0x1e2   : > { %616 = vst [vmem:[%s311_s23 + $0x10] sm:$0xff] %v598_v59 }
 0x1e3   : > { %617 = vst [vmem:[%s311_s23 + $0x18] sm:$0xff] %v600_v62  ;;  %v603_v63 = vpop.f32.mrb[4].mxu1 }
 0x1e4   : > { %v604_v0 = vadd.f32 %v603_v63, %v505_v61  ;;  %v605_v1 = vpop.f32.mrb[5].mxu1 }
 0x1e5   : > { %v606_v2 = vadd.f32 %v605_v1, %v505_v61 }
 0x1e6   : > { %618 = vst [vmem:[%s311_s23 + $0x20] sm:$0xff] %v604_v0 }
 0x1e7   : > { %619 = vst [vmem:[%s311_s23 + $0x28] sm:$0xff] %v606_v2  ;;  %v609_v4 = vpop.f32.mrb[6].mxu1 }
 0x1e8   : > { %v610_v5 = vadd.f32 %v609_v4, %v510_v3  ;;  %v611_v6 = vpop.f32.mrb[7].mxu1 }
 0x1e9   : > { %v612_v7 = vadd.f32 %v611_v6, %v510_v3 }
 0x1ea   : > { %620 = vst [vmem:[%s311_s23 + $0x30] sm:$0xff] %v610_v5 }
 0x1eb   : > { %621 = vst [vmem:[%s311_s23 + $0x38] sm:$0xff] %v612_v7 }
 0x1ec   : > { %991 = shalt.err (!%p988_p10)
}
 0x1ed   : > { %s992_s23 = scalar_lea.hbm %s1296_s12, 1024  ;;  %s996_s21 = scalar_lea.hbm %s1355_s6, 2048 }
 0x1ee   : > { %p993_p11 = scmp.ne.s32.totalorder %s1296_s12, %s992_s23  ;;  %p997_p0 = scmp.lt.u32.totalorder %s1296_s12, %s1355_s6 }
 0x1ef   : > { %p998_p1 = scmp.lt.u32.totalorder %s996_s21, %s992_s23  ;;  %p1000_p3 = scmp.lt.u32.totalorder %s992_s23, %s1296_s12 }
 0x1f0   : > { %p994_p12 = pnand %p993_p11, %p1148_p4 }
 0x1f1   : > { %p999_p2 = por %p998_p1, %p997_p0 }
 0x1f2   : > { %p995_p13 = pneg %p994_p12 }
 0x1f3   : > { %p1001_p5 = por %p1000_p3, %p999_p2 }
 0x1f5   : > { %p1002_p6 = pnand %p1001_p5, %p995_p13 }
 0x1f7   : > { %1005 = shalt.err (!%p1002_p6)
}
 0x1f8   : > { %885 = dma.vmem_to_hbm [thread:$0]  (%p1148_p4), %s1298_s16, 1024, %s1296_s12, %s645_s22, %s1065_s18, %s1065_s18, %s1066_s15  }
 0x1f9 PF: > { %p895_p7 = scmp.ge.s32.totalorder %s1060_s29, 2  ;;  %s705_s8 = sand.u32 1, %s1040_s24  }
 0x1fa   : > { %s706_s19 = scalar_lea.sflag [#allocation3], %s705_s8 }
 0x1fb   : > { %p889_p9 = pnand %p895_p7, %p1155_p8 }
 0x1fd   : > { %1031 = dma.done.wait (!%p889_p9), %s706_s19, 1024  }
 0x1fe   : > { %1033 = vsyncadd (!%p889_p9), %s706_s19, 4294966272  ;;  %s715_s11 = scalar_lea.sflag [#allocation5], %s705_s8 }
 0x1ff   : > { %1035 = dma.done.wait (!%p889_p9), %s715_s11, 1024  }
 0x200   : > { %1037 = vsyncadd (!%p889_p9), %s715_s11, 4294966272  ;;  %s24_s29 = sadd.s32 1, %s1060_s29   ;;  %s1363_s24 = smov %s1044_s25 }
 0x201   : > { %p21_p10 = scmp.ge.s32.totalorder %s24_s29, 4   ;;  %s1364_s25 = smov %s1048_s26 }
 0x202   : > { %s1365_s26 = smov %s1161_s14  ;;  %s1366_s27 = smov %s1056_s28 }
 0x203   : > { %s1367_s28 = smov %s1369_s9  ;;  %23 = sbr.rel (!%p21_p10) target bundleno = 6 (0x6), region = 104 }
 0x20a   :  { %732 = vsyncpa [#allocation3], 1 }
 0x20b   :  { %734 = vsyncpa [#allocation3 + $0x1], 1 }
 0x20c   :  { %735 = vsyncpa [#allocation5], 1 }
 0x20d   :  { %737 = vsyncpa [#allocation5 + $0x1], 1 }

</bundles_post_ra>
